<compile_context>
chip_gen: v6e
topology: v6e:2x2x1
jax: 0.10.0
libtpu: 0.0.40
codegen_flags: <defaults>
</compile_context>

<pallas_src>
import jax
import jax.numpy as jnp
import numpy as np
from jax.experimental import pallas as pl
from jax.experimental.pallas import tpu as pltpu


def _round_up(x, m):
    return ((x + m - 1) // m) * m


def _make_eig_loss_kernel(*, b_tile, batch, tiles_per_group, length,
                          use_band_mask, period, band_lo, band_hi,
                          emin, emax, eout_weight, denom, inv_b):
    """Builds a kernel with all loss hyper-parameters baked in statically."""
    eout_weight = float(eout_weight)
    inv_b = float(inv_b)
    inv_denom = 1.0 / float(denom)

    def kernel(pred_ref, label_ref, out_ref):
        g = pl.program_id(0)          # parallel group (TensorCore on v7x)
        t = pl.program_id(1)          # sequential tile within the group

        @pl.when(t == 0)
        def _init():
            out_ref[...] = jnp.zeros_like(out_ref)

        # (b_tile, length) lane-dense blocks, upcast to f32 in vregs.
        pred = pred_ref[...].astype(jnp.float32)
        label = label_ref[...].astype(jnp.float32)

        if use_band_mask:
            # periodic band-window mask: lane % period in [band_lo, band_hi)
            lane = jax.lax.broadcasted_iota(jnp.int32, (b_tile, length), 1)
            pos = lane % period
            band = jnp.logical_and(pos >= band_lo, pos < band_hi)
            inf = jnp.float32(jnp.inf)
            pred_min = jnp.min(jnp.where(band, pred, inf), axis=1,
                               keepdims=True)
            label_min = jnp.min(jnp.where(band, label, inf), axis=1,
                                keepdims=True)
        else:
            band = None
            pred_min = jnp.min(pred, axis=1, keepdims=True)
            label_min = jnp.min(label, axis=1, keepdims=True)

        # shift every structure's spectrum so its (band-window) minimum is 0
        pred = pred - pred_min
        label = label - label_min
        diff2 = (pred - label) ** 2

        if emin is None and emax is None:
            # no energy window -> plain per-structure MSE over the band cut
            d = diff2 if band is None else jnp.where(band, diff2, 0.0)
            per_struct = jnp.sum(d, axis=1, keepdims=True) * inv_denom
        else:
            if emin is not None and emax is not None:
                w_in = jnp.logical_and(label < emax, label > emin)
                w_out = jnp.logical_or(label > emax, label < emin)
            elif emax is not None:
                w_in = label < emax
                w_out = label > emax
            else:  # emin only
                w_in = label > emin
                w_out = label < emin
            if band is not None:
                w_in = jnp.logical_and(w_in, band)
                w_out = jnp.logical_and(w_out, band)

            in_cnt = jnp.sum(w_in.astype(jnp.float32), axis=1, keepdims=True)
            out_cnt = jnp.sum(w_out.astype(jnp.float32), axis=1, keepdims=True)
            in_sum = jnp.sum(jnp.where(w_in, diff2, 0.0), axis=1,
                             keepdims=True)
            out_sum = jnp.sum(jnp.where(w_out, diff2, 0.0), axis=1,
                              keepdims=True)

            in_term = jnp.where(in_cnt > 0.0,
                                in_sum / jnp.maximum(in_cnt, 1.0), 0.0)
            out_term = jnp.where(out_cnt > 0.0,
                                 out_sum / jnp.maximum(out_cnt, 1.0), 0.0)
            per_struct = in_term + eout_weight * out_term  # (b_tile, 1)

        # mask tail rows of the last tile and duplicated (clamped) tiles
        row = jax.lax.broadcasted_iota(jnp.int32, (b_tile, 1), 0)
        struct_idx = (g * tiles_per_group + t) * b_tile + row
        per_struct = jnp.where(struct_idx < batch, per_struct, 0.0)

        # accumulate this group's share of the batch mean into the resident
        # (1,1,1) partial accumulator
        out_ref[...] = out_ref[...] + jnp.sum(per_struct) * inv_b

    return kernel


def eig_loss(eig_pred, eig_label, *, band_min=0, band_max=None,
             emin=None, emax=None, eout_weight=0.01,
             max_structs_per_step=None):
    """Pallas implementation of EigLoss.forward (diff_on=False).

    eig_pred : (B, num_kp, norbs)     predicted eigenvalues per structure
    eig_label: (B, num_kp, nbanddft)  reference eigenvalues per structure
    Returns scalar loss = mean over the B structures.
    `max_structs_per_step` is an optional cap on structures per grid step
    (mainly for testing the multi-tile / multi-group path).
    """
    eig_pred = jnp.asarray(eig_pred)
    eig_label = jnp.asarray(eig_label)
    B, K, norbs = eig_pred.shape
    assert eig_label.ndim == 3
    assert eig_label.shape[0] == B and eig_label.shape[1] == K
    nbanddft = eig_label.shape[-1]
    up_nband = min(norbs, nbanddft)
    if band_max is None:
        band_max = up_nband
    band_min = int(band_min)
    band_max = int(band_max)
    assert band_max <= up_nband
    assert band_min < band_max
    n_cut = band_max - band_min

    # ---- lane-dense 2-D views ---------------------------------------------
    if norbs == nbanddft:
        # Free metadata reshape; the band window becomes a periodic lane mask
        # inside the kernel (no wrapper copy, no wasted lanes).
        pred2d = eig_pred.reshape(B, K * norbs)
        label2d = eig_label.reshape(B, K * nbanddft)
        use_band_mask = not (band_min == 0 and band_max == norbs)
        period, band_lo, band_hi = norbs, band_min, band_max
        L = K * norbs
    else:
        # pred/label band elements sit at different lane offsets when the
        # trailing dims differ; realign once in the wrapper (one streaming
        # copy) so the kernel is fully lane-dense, mask-free, and never
        # DMA's discarded bands.
        pred2d = eig_pred[:, :, band_min:band_max].reshape(B, K * n_cut)
        label2d = eig_label[:, :, band_min:band_max].reshape(B, K * n_cut)
        use_band_mask = False
        period, band_lo, band_hi = n_cut, 0, n_cut
        L = K * n_cut

    # ---- b_tile sizing from the *padded* VMEM layout ------------------------
    try:
        vmem_cap = int(getattr(pltpu.get_tpu_info(), "vmem_capacity_bytes",
                               64 * 2**20))
    except Exception:  # pragma: no cover - conservative fallback
        vmem_cap = 64 * 2**20
    budget = min(16 * 2**20, vmem_cap // 4)

    lanes_pad = _round_up(L, 128)
    in_bytes = lanes_pad * (jnp.dtype(pred2d.dtype).itemsize
                            + jnp.dtype(label2d.dtype).itemsize)
    tmp_bytes = 6 * lanes_pad * 4                  # f32 temporaries per row
    per_struct_bytes = 2 * in_bytes + tmp_bytes    # x2 = double buffering
    cap = max(1, int(budget) // int(per_struct_bytes))
    if max_structs_per_step is not None:
        cap = min(cap, int(max_structs_per_step))

    if B <= cap:
        b_tile = B                                 # whole batch in one step
    else:
        b_tile = max(8, (cap // 8) * 8)            # sublane-aligned tile
    num_tiles = (B + b_tile - 1) // b_tile

    # ---- split tiles over (up to) 2 parallel groups (v7x: 2 TensorCores) ---
    n_groups = 2 if num_tiles >= 2 else 1
    tiles_per_group = (num_tiles + n_groups - 1) // n_groups

    step_bytes = _round_up(b_tile, 8) * per_struct_bytes
    vmem_limit = int(min(max(32 * 2**20, 2 * step_bytes), vmem_cap))

    kernel = _make_eig_loss_kernel(
        b_tile=b_tile, batch=B, tiles_per_group=tiles_per_group, length=L,
        use_band_mask=use_band_mask, period=period,
        band_lo=band_lo, band_hi=band_hi,
        emin=None if emin is None else float(emin),
        emax=None if emax is None else float(emax),
        eout_weight=float(eout_weight), denom=K * n_cut,
        inv_b=1.0 / float(B))

    def in_map(g, t):
        # clamp so out-of-range (g, t) pairs re-read the last real tile;
        # their contribution is zeroed by the in-kernel validity mask.
        return (jnp.minimum(g * tiles_per_group + t, num_tiles - 1), 0)

    out = pl.pallas_call(
        kernel,
        out_shape=jax.ShapeDtypeStruct((n_groups, 1, 1), jnp.float32),
        grid_spec=pltpu.PrefetchScalarGridSpec(
            num_scalar_prefetch=0,
            grid=(n_groups, tiles_per_group),
            in_specs=[
                pl.BlockSpec((b_tile, L), in_map),
                pl.BlockSpec((b_tile, L), in_map),
            ],
            # one resident (1,1,1) partial accumulator per parallel group
            out_specs=pl.BlockSpec((1, 1, 1), lambda g, t: (g, 0, 0)),
        ),
        compiler_params=pltpu.CompilerParams(
            dimension_semantics=("parallel", "arbitrary"),
            vmem_limit_bytes=vmem_limit),
    )(pred2d, label2d)

    # sum the (<= 2) per-group partial means -> batch mean
    return jnp.sum(out)


def _reference_loss(pred, label, band_min, band_max, emin, emax, eout_w):
    """Plain numpy mirror of the torch semantics, for verification."""
    pred = np.asarray(pred, np.float32)
    label = np.asarray(label, np.float32)
    losses = []
    for b in range(pred.shape[0]):
        p = pred[b, :, band_min:band_max]
        l = label[b, :, band_min:band_max]
        p = p - p.min()
        l = l - l.min()
        if emax is not None and emin is not None:
            m_in = (l < emax) & (l > emin)
            m_out = (l > emax) | (l < emin)
        elif emax is not None:
            m_in = l < emax
            m_out = l > emax
        elif emin is not None:
            m_in = l > emin
            m_out = l < emin
        else:
            m_in = None
            m_out = None
        if m_in is not None:
            loss = 0.0
            if m_in.any():
                loss = np.mean((p[m_in] - l[m_in]) ** 2)
            if m_out.any():
                loss = loss + eout_w * np.mean((p[m_out] - l[m_out]) ** 2)
        else:
            loss = np.mean((p - l) ** 2)
        losses.append(loss)
    return float(sum(losses) / len(losses))


if __name__ == "__main__":
    key = jax.random.PRNGKey(0)
    k1, k2, k3, k4 = jax.random.split(key, 4)

    # --- case 1/2: norbs != nbanddft -> wrapper band-cut path, single tile --
    B, K, norbs, nbanddft = 2, 8, 32, 24
    band_min, band_max = 0, 20
    eig_pred = jnp.sort(
        jax.random.uniform(k1, (B, K, norbs), jnp.float32, -2.0, 10.0), axis=-1)
    eig_label = jnp.sort(
        eig_pred[:, :, :nbanddft]
        + 0.1 * jax.random.normal(k2, (B, K, nbanddft), jnp.float32), axis=-1)

    loss = eig_loss(eig_pred, eig_label, band_min=band_min, band_max=band_max,
                    emin=0.0, emax=6.0, eout_weight=0.01)
    loss = jax.block_until_ready(loss)
    ref = _reference_loss(eig_pred, eig_label, band_min, band_max,
                          0.0, 6.0, 0.01)
    np.testing.assert_allclose(float(loss), ref, rtol=1e-4, atol=1e-6)

    loss2 = eig_loss(eig_pred, eig_label, band_min=band_min, band_max=band_max,
                     emin=None, emax=None, eout_weight=0.01)
    loss2 = jax.block_until_ready(loss2)
    ref2 = _reference_loss(eig_pred, eig_label, band_min, band_max,
                           None, None, 0.01)
    np.testing.assert_allclose(float(loss2), ref2, rtol=1e-4, atol=1e-6)

    # --- case 3/4: norbs == nbanddft -> free-reshape + periodic band mask,
    #               multi-tile grid, 2 parallel groups, tail masking ---------
    B2, K2, n2 = 21, 8, 32
    band_min2, band_max2 = 4, 28
    pred2 = jnp.sort(
        jax.random.uniform(k3, (B2, K2, n2), jnp.float32, -2.0, 10.0), axis=-1)
    label2 = jnp.sort(
        pred2 + 0.1 * jax.random.normal(k4, (B2, K2, n2), jnp.float32), axis=-1)

    loss3 = eig_loss(pred2, label2, band_min=band_min2, band_max=band_max2,
                     emin=0.0, emax=6.0, eout_weight=0.01,
                     max_structs_per_step=8)
    loss3 = jax.block_until_ready(loss3)
    ref3 = _reference_loss(pred2, label2, band_min2, band_max2,
                           0.0, 6.0, 0.01)
    np.testing.assert_allclose(float(loss3), ref3, rtol=1e-4, atol=1e-6)

    loss4 = eig_loss(pred2, label2, band_min=band_min2, band_max=band_max2,
                     emin=None, emax=6.0, eout_weight=0.01,
                     max_structs_per_step=8)
    loss4 = jax.block_until_ready(loss4)
    ref4 = _reference_loss(pred2, label2, band_min2, band_max2,
                           None, 6.0, 0.01)
    np.testing.assert_allclose(float(loss4), ref4, rtol=1e-4, atol=1e-6)

    print("KERNEL_OK")
</pallas_src>

<mosaic_0001>
module attributes {stable_mosaic.version = 11 : i64} {
  func.func @kernel(%arg0: i32, %arg1: i32, %arg2: memref<2x160xf32, #tpu.memory_space<vmem>>, %arg3: memref<2x160xf32, #tpu.memory_space<vmem>>, %arg4: memref<1x1x1xf32, #tpu.memory_space<vmem>>) attributes {dimension_semantics = [#tpu.dimension_semantics<parallel>, #tpu.dimension_semantics<arbitrary>], iteration_bounds = array<i64: 1, 1>, scalar_prefetch = 0 : i64, scratch_operands = 0 : i64, tpu.core_type = #tpu.core_type<tc>, window_params = [{transform_indices = @transform_0, window_bounds = array<i64: 2, 160>}, {transform_indices = @transform_1, window_bounds = array<i64: 2, 160>}, {transform_indices = @transform_2, window_bounds = array<i64: 1, 1, 1>}]} {
    %c0_i32 = arith.constant 0 : i32
    %0 = arith.cmpi eq, %arg1, %c0_i32 : i32
    %1 = arith.extui %0 : i1 to i32
    %c0_i32_0 = arith.constant 0 : i32
    %2 = arith.cmpi ne, %1, %c0_i32_0 : i32
    scf.if %2 {
      %cst_32 = arith.constant 0.000000e+00 : f32
      %77 = vector.broadcast %cst_32 : f32 to vector<1x1x1xf32>
      %c0_33 = arith.constant 0 : index
      %c0_34 = arith.constant 0 : index
      %c0_35 = arith.constant 0 : index
      %78 = vector.load %arg4[%c0_33, %c0_34, %c0_35] : memref<1x1x1xf32, #tpu.memory_space<vmem>>, vector<1x1x1xf32>
      tpu.vector_store %arg4[%c0_33, %c0_34, %c0_35], %77 {strides = array<i32>} : memref<1x1x1xf32, #tpu.memory_space<vmem>>, vector<1x1x1xf32>,
    } else {
    }
    %c0 = arith.constant 0 : index
    %c0_1 = arith.constant 0 : index
    %3 = vector.load %arg2[%c0, %c0_1] : memref<2x160xf32, #tpu.memory_space<vmem>>, vector<2x160xf32>
    %c0_2 = arith.constant 0 : index
    %c0_3 = arith.constant 0 : index
    %4 = vector.load %arg3[%c0_2, %c0_3] : memref<2x160xf32, #tpu.memory_space<vmem>>, vector<2x160xf32>
    %cst = arith.constant dense<0x7F800000> : vector<2xf32>
    %5 = vector.multi_reduction <minimumf>, %3, %cst [1] : vector<2x160xf32> to vector<2xf32>
    %6 = vector.shape_cast %5 : vector<2xf32> to vector<2x1xf32>
    %cst_4 = arith.constant dense<0x7F800000> : vector<2xf32>
    %7 = vector.multi_reduction <minimumf>, %4, %cst_4 [1] : vector<2x160xf32> to vector<2xf32>
    %8 = vector.shape_cast %7 : vector<2xf32> to vector<2x1xf32>
    %9 = vector.broadcast %6 : vector<2x1xf32> to vector<2x160xf32>
    %10 = arith.subf %3, %9 : vector<2x160xf32>
    %11 = vector.broadcast %8 : vector<2x1xf32> to vector<2x160xf32>
    %12 = arith.subf %4, %11 : vector<2x160xf32>
    %13 = arith.subf %10, %12 : vector<2x160xf32>
    %14 = arith.mulf %13, %13 : vector<2x160xf32>
    %cst_5 = arith.constant 6.000000e+00 : f32
    %15 = vector.broadcast %cst_5 : f32 to vector<2x160xf32>
    %16 = arith.cmpf olt, %12, %15 : vector<2x160xf32>
    %cst_6 = arith.constant 0.000000e+00 : f32
    %17 = vector.broadcast %cst_6 : f32 to vector<2x160xf32>
    %18 = arith.cmpf ogt, %12, %17 : vector<2x160xf32>
    %19 = arith.andi %16, %18 : vector<2x160xi1>
    %cst_7 = arith.constant 6.000000e+00 : f32
    %20 = vector.broadcast %cst_7 : f32 to vector<2x160xf32>
    %21 = arith.cmpf ogt, %12, %20 : vector<2x160xf32>
    %cst_8 = arith.constant 0.000000e+00 : f32
    %22 = vector.broadcast %cst_8 : f32 to vector<2x160xf32>
    %23 = arith.cmpf olt, %12, %22 : vector<2x160xf32>
    %24 = arith.ori %21, %23 : vector<2x160xi1>
    %25 = arith.extui %19 : vector<2x160xi1> to vector<2x160xi32>
    %26 = arith.sitofp %25 : vector<2x160xi32> to vector<2x160xf32>
    %cst_9 = arith.constant dense<0.000000e+00> : vector<2xf32>
    %27 = vector.multi_reduction <add>, %26, %cst_9 [1] : vector<2x160xf32> to vector<2xf32>
    %28 = vector.shape_cast %27 : vector<2xf32> to vector<2x1xf32>
    %29 = arith.extui %24 : vector<2x160xi1> to vector<2x160xi32>
    %30 = arith.sitofp %29 : vector<2x160xi32> to vector<2x160xf32>
    %cst_10 = arith.constant dense<0.000000e+00> : vector<2xf32>
    %31 = vector.multi_reduction <add>, %30, %cst_10 [1] : vector<2x160xf32> to vector<2xf32>
    %32 = vector.shape_cast %31 : vector<2xf32> to vector<2x1xf32>
    %cst_11 = arith.constant 0.000000e+00 : f32
    %33 = vector.broadcast %cst_11 : f32 to vector<2x160xf32>
    %34 = arith.select %19, %14, %33 : vector<2x160xi1>, vector<2x160xf32>
    %cst_12 = arith.constant dense<0.000000e+00> : vector<2xf32>
    %35 = vector.multi_reduction <add>, %34, %cst_12 [1] : vector<2x160xf32> to vector<2xf32>
    %36 = vector.shape_cast %35 : vector<2xf32> to vector<2x1xf32>
    %cst_13 = arith.constant 0.000000e+00 : f32
    %37 = vector.broadcast %cst_13 : f32 to vector<2x160xf32>
    %38 = arith.select %24, %14, %37 : vector<2x160xi1>, vector<2x160xf32>
    %cst_14 = arith.constant dense<0.000000e+00> : vector<2xf32>
    %39 = vector.multi_reduction <add>, %38, %cst_14 [1] : vector<2x160xf32> to vector<2xf32>
    %40 = vector.shape_cast %39 : vector<2xf32> to vector<2x1xf32>
    %cst_15 = arith.constant 0.000000e+00 : f32
    %41 = vector.broadcast %cst_15 : f32 to vector<2x1xf32>
    %42 = arith.cmpf ogt, %28, %41 : vector<2x1xf32>
    %cst_16 = arith.constant 1.000000e+00 : f32
    %43 = vector.broadcast %cst_16 : f32 to vector<2x1xf32>
    %44 = arith.maximumf %28, %43 : vector<2x1xf32>
    %45 = arith.divf %36, %44 : vector<2x1xf32>
    %cst_17 = arith.constant 0.000000e+00 : f32
    %46 = vector.broadcast %cst_17 : f32 to vector<2x1xf32>
    %47 = arith.select %42, %45, %46 : vector<2x1xi1>, vector<2x1xf32>
    %cst_18 = arith.constant 0.000000e+00 : f32
    %48 = vector.broadcast %cst_18 : f32 to vector<2x1xf32>
    %49 = arith.cmpf ogt, %32, %48 : vector<2x1xf32>
    %cst_19 = arith.constant 1.000000e+00 : f32
    %50 = vector.broadcast %cst_19 : f32 to vector<2x1xf32>
    %51 = arith.maximumf %32, %50 : vector<2x1xf32>
    %52 = arith.divf %40, %51 : vector<2x1xf32>
    %cst_20 = arith.constant 0.000000e+00 : f32
    %53 = vector.broadcast %cst_20 : f32 to vector<2x1xf32>
    %54 = arith.select %49, %52, %53 : vector<2x1xi1>, vector<2x1xf32>
    %cst_21 = arith.constant 0.00999999977 : f32
    %55 = vector.broadcast %cst_21 : f32 to vector<2x1xf32>
    %56 = arith.mulf %55, %54 : vector<2x1xf32>
    %57 = arith.addf %47, %56 : vector<2x1xf32>
    %58 = tpu.iota {dimensions = array<i32: 0>} : vector<2x1xi32>
    %c1_i32 = arith.constant 1 : i32
    %59 = arith.muli %arg0, %c1_i32 : i32
    %60 = arith.addi %59, %arg1 : i32
    %c2_i32 = arith.constant 2 : i32
    %61 = arith.muli %60, %c2_i32 : i32
    %62 = vector.broadcast %61 : i32 to vector<2x1xi32>
    %63 = arith.addi %62, %58 : vector<2x1xi32>
    %c2_i32_22 = arith.constant 2 : i32
    %64 = vector.broadcast %c2_i32_22 : i32 to vector<2x1xi32>
    %65 = arith.cmpi slt, %63, %64 : vector<2x1xi32>
    %cst_23 = arith.constant 0.000000e+00 : f32
    %66 = vector.broadcast %cst_23 : f32 to vector<2x1xf32>
    %67 = arith.select %65, %57, %66 : vector<2x1xi1>, vector<2x1xf32>
    %c0_24 = arith.constant 0 : index
    %c0_25 = arith.constant 0 : index
    %c0_26 = arith.constant 0 : index
    %68 = vector.load %arg4[%c0_24, %c0_25, %c0_26] : memref<1x1x1xf32, #tpu.memory_space<vmem>>, vector<1x1x1xf32>
    %69 = vector.shape_cast %67 : vector<2x1xf32> to vector<1x2x1xf32>
    %cst_27 = arith.constant dense<0.000000e+00> : vector<1xf32>
    %70 = vector.multi_reduction <add>, %69, %cst_27 [1, 2] : vector<1x2x1xf32> to vector<1xf32>
    %71 = vector.shape_cast %70 : vector<1xf32> to vector<1x1x1xf32>
    %72 = vector.extract %71[0, 0, 0] : f32 from vector<1x1x1xf32>
    %cst_28 = arith.constant 5.000000e-01 : f32
    %73 = arith.mulf %72, %cst_28 : f32
    %74 = vector.broadcast %73 : f32 to vector<1x1x1xf32>
    %75 = arith.addf %68, %74 : vector<1x1x1xf32>
    %c0_29 = arith.constant 0 : index
    %c0_30 = arith.constant 0 : index
    %c0_31 = arith.constant 0 : index
    %76 = vector.load %arg4[%c0_29, %c0_30, %c0_31] : memref<1x1x1xf32, #tpu.memory_space<vmem>>, vector<1x1x1xf32>
    tpu.vector_store %arg4[%c0_29, %c0_30, %c0_31], %75 {strides = array<i32>} : memref<1x1x1xf32, #tpu.memory_space<vmem>>, vector<1x1x1xf32>,
    return
  }
  func.func @transform_0(%arg0: i32, %arg1: i32) -> (i32, i32) {
    %c1_i32 = arith.constant 1 : i32
    %0 = arith.muli %arg0, %c1_i32 : i32
    %1 = arith.addi %0, %arg1 : i32
    %c0_i32 = arith.constant 0 : i32
    %2 = arith.minsi %1, %c0_i32 : i32
    %c0_i32_0 = arith.constant 0 : i32
    %c0_i32_1 = arith.constant 0 : i32
    return %2, %c0_i32_0 : i32, i32
  }
  func.func @transform_1(%arg0: i32, %arg1: i32) -> (i32, i32) {
    %c1_i32 = arith.constant 1 : i32
    %0 = arith.muli %arg0, %c1_i32 : i32
    %1 = arith.addi %0, %arg1 : i32
    %c0_i32 = arith.constant 0 : i32
    %2 = arith.minsi %1, %c0_i32 : i32
    %c0_i32_0 = arith.constant 0 : i32
    %c0_i32_1 = arith.constant 0 : i32
    return %2, %c0_i32_0 : i32, i32
  }
  func.func @transform_2(%arg0: i32, %arg1: i32) -> (i32, i32, i32) {
    %c0_i32 = arith.constant 0 : i32
    %c0_i32_0 = arith.constant 0 : i32
    %c0_i32_1 = arith.constant 0 : i32
    return %arg0, %c0_i32, %c0_i32_0 : i32, i32, i32
  }
}

</mosaic_0001>

<bundles_post_ra>
// kernel: tpu_custom_call.1
= control target key start
LH: loop header
LB: loop body
LE: loop exit
PB: predicated region body
PF: predicated region fallthrough
CT: control target
= control target key end

     0   :  { %7 = vsyncpa [#allocation3], 0  ;;  %s388_s0 = inlined_call_operand.hbm [shape: f32[2,160], index: 0, kind: input, shape index: {}]   ;;  %s389_s1 = inlined_call_operand.hbm [shape: f32[2,160], index: 1, kind: input, shape index: {}]   ;;  %s390_s2 = inlined_call_operand.hbm [shape: f32[1,1,1], index: 2, kind: output, shape index: {}]  }
   0x1   :  { %8 = vsyncpa [#allocation6], 0 }
   0x2   :  { %9 = vsyncpa [#allocation4], 0  ;;  %s331_s9 = smov [#allocation2]   ;;  %s332_s11 = smov [#allocation5]  }
   0x3   :  { %s22_s10 = sshll.u32 %s331_s9, 4  ;;  %s38_s12 = sshll.u32 %s332_s11, 4  ;;  %s23_s10 = int_to_ptr.vmem [resolvable:$true] %s22_s10  ;;  %s39_s12 = int_to_ptr.vmem [resolvable:$true] %s38_s12 }
   0x4   :  { %s273_s13 = scalar_lea.vmem %s23_s10, 64  ;;  %p278_p1 = scmp.lt.s32.totalorder %s23_s10, %s23_s10 }
   0x5   :  { %p274_p0 = scmp.ne.s32.totalorder %s23_s10, %s273_s13  ;;  %p279_p2 = scmp.lt.s32.totalorder %s273_s13, %s273_s13 }
   0x7   :  { %p280_p3 = por %p279_p2, %p278_p1 }
   0x9   :  { %p281_p4 = pnand %p280_p3, %p274_p0 }
   0xb   :  { %284 = shalt.err (!%p281_p4)
}
   0xc   :  { %25 = dma.hbm_to_vmem [thread:$0]  %s388_s0, 64, %s23_s10, [#allocation3]  }
   0xd   :  { %s293_s16 = scalar_lea.vmem %s39_s12, 64  ;;  %p298_p6 = scmp.lt.s32.totalorder %s39_s12, %s39_s12 }
   0xe   :  { %p294_p5 = scmp.ne.s32.totalorder %s39_s12, %s293_s16  ;;  %p299_p7 = scmp.lt.s32.totalorder %s293_s16, %s293_s16 }
  0x10   :  { %p300_p8 = por %p299_p7, %p298_p6 }
  0x12   :  { %p301_p9 = pnand %p300_p8, %p294_p5 }
  0x14   :  { %304 = shalt.err (!%p301_p9)
}
  0x15   :  { %41 = dma.hbm_to_vmem [thread:$0]  %s389_s1, 64, %s39_s12, [#allocation6]  }
  0x16   :  { %325 = dma.done.wait [#allocation3], 64  }
  0x17   :  { %326 = vsyncadd [#allocation3], 4294967232 }
  0x18   :  { %327 = dma.done.wait [#allocation6], 64  }
  0x19   :  { %328 = vsyncadd [#allocation6], 4294967232  ;;  %v66_v0 = vlaneseq  ;;  %v333_v1 = vmov 1983009808   ;;  %v61_v6 = vld [vmem:[#allocation5] sm:$0xf] }
  0x1a   :  { %v64_v2 = vunpack.c.l.s4 %v333_v1  ;;  %vm73_vm0 = vcmask 1041408   ;;  %v60_v7 = vld [vmem:[#allocation2] sm:$0xf]  ;;  %vm75_vm1 = vcmask 254976   ;;  %vm58_vm2 = vcmask 0   ;;  %s336_s19 = smov [#allocation7]  }
  0x1b   :  { %v358_v3 = vshrl.u32 %v66_v0, 7  ;;  %v334_v18 = vmov 0.0   ;;  %v335_v19 = vmov 269488144   ;;  %vm215_vm12 = vcmask 1024   ;;  %s237_s20 = sshll.u32 %s336_s19, 4  ;;  %s238_s20 = int_to_ptr.vmem [resolvable:$true] %s237_s20 }
  0x1c   :  { %v65_v4 = vunpack.c.0.s8 %v64_v2  ;;  %59 = vst.msk [vmem:[#allocation7] sm:$0x1] %vm58_vm2, %v334_v18  ;;  %v98_v20 = vunpack.c.l.s4 %v335_v19  ;;  %s305_s21 = scalar_lea.vmem %s238_s20, 16  ;;  %s309_s22 = scalar_lea.vmem %s238_s20, 32 }
  0x1d   :  { %vm212_vm11 = vcmp.lt.s32.totalorder %v358_v3, 2  ;;  %p306_p10 = scmp.ne.s32.totalorder %s238_s20, %s305_s21  ;;  %p310_p11 = scmp.lt.s32.totalorder %s238_s20, %s238_s20 }
  0x1e   :  { %v68_v5 = vsub.s32 %v65_v4, %v358_v3  ;;  %v99_v21 = vunpack.c.0.s8 %v98_v20  ;;  %p311_p12 = scmp.lt.s32.totalorder %s309_s22, %s305_s21 }
  0x20   :  { %v87_v8 = vrot.slane %v61_v6, %v68_v5  ;;  %v69_v9 = vrot.slane %v60_v7, %v68_v5  ;;  %v102_v22 = vsub.s32 %v99_v21, %v358_v3  ;;  %p312_p13 = por %p311_p12, %p310_p11 }
  0x22   :  { %v88_v10 = vcombine.high %v87_v8, %v87_v8  ;;  %v91_v11 = vsel %vm73_vm0, %v87_v8, inf  ;;  %v70_v12 = vcombine.high %v69_v9, %v69_v9  ;;  %v74_v14 = vsel %vm73_vm0, %v69_v9, inf  ;;  %p313_p0 = pnand %p312_p13, %p306_p10 }
  0x24   :  { %v92_v13 = vsel %vm75_vm1, %v88_v10, inf  ;;  %v76_v15 = vsel %vm75_vm1, %v70_v12, inf }
  0x25   :  { %v93_v16 = vmin.f32 %v91_v11, %v92_v13  ;;  %v77_v17 = vmin.f32 %v74_v14, %v76_v15 }
  0x27   :  { %94 = vmin.xlane.f32.xlu0 %v93_v16  ;;  %v214_v16 = vld [vmem:[#allocation7] sm:$0x1] }
  0x2b   :  { %78 = vmin.xlane.f32.xlu0 %v77_v17 }
  0xb0   :  { %v95_v23 = vpop.xlane.xlu0 %94 }
  0xb1   :  { %v113_v24 = vrot.slane %v95_v23, %v102_v22 }
  0xb3   :  { %v115_v25 = vsub.f32 %v61_v6, %v113_v24 }
  0xb4   :  { %v79_v26 = vpop.xlane.xlu0 %78 }
  0xb5   :  { %v103_v27 = vrot.slane %v79_v26, %v102_v22  ;;  %vm121_vm3 = vcmp.gt.f32.partialorder %v115_v25, 6.0  ;;  %vm122_vm4 = vcmp.lt.f32.partialorder %v115_v25, 0.0  ;;  %vm118_vm5 = vcmp.lt.f32.partialorder %v115_v25, 6.0 }
  0xb6   :  { %vm367_vm6 = vmor %vm121_vm3, %vm122_vm4  ;;  %vm119_vm7 = vcmp.gt.f32.partialorder %v115_v25, 0.0 }
  0xb7   :  { %v105_v29 = vsub.f32 %v60_v7, %v103_v27  ;;  %v252_v30 = vsel %vm367_vm6, 1.0, %v334_v18  ;;  %vm120_vm8 = vmand %vm118_vm5, %vm119_vm7 }
  0xb8   :  { %v151_v31 = vrot.slane %v252_v30, %v68_v5  ;;  %v251_v32 = vsel %vm120_vm8, 1.0, %v334_v18 }
  0xb9   :  { %v116_v33 = vsub.f32 %v105_v29, %v115_v25  ;;  %v133_v34 = vrot.slane %v251_v32, %v68_v5 }
  0xba   :  { %v152_v35 = vcombine.high %v151_v31, %v151_v31  ;;  %v155_v38 = vsel %vm73_vm0, %v151_v31, 0.0 }
  0xbb   :  { %v117_v36 = vmul.f32 %v116_v33, %v116_v33  ;;  %v134_v37 = vcombine.high %v133_v34, %v133_v34  ;;  %v137_v46 = vsel %vm73_vm0, %v133_v34, 0.0 }
  0xbc   :  { %v156_v39 = vsel %vm75_vm1, %v152_v35, 0.0 }
  0xbd   :  { %v157_v40 = vadd.f32 %v156_v39, %v155_v38  ;;  %v177_v41 = vsel %vm367_vm6, %v117_v36, 0.0  ;;  %v160_v42 = vsel %vm120_vm8, %v117_v36, 0.0  ;;  %v138_v43 = vsel %vm75_vm1, %v134_v37, 0.0 }
  0xbe   :  { %v185_v44 = vrot.slane %v177_v41, %v68_v5  ;;  %v168_v45 = vrot.slane %v160_v42, %v68_v5  ;;  %v139_v49 = vadd.f32 %v138_v43, %v137_v46 }
  0xbf   :  { %158 = vadd.xlane.f32.xlu1 %v157_v40 }
  0xc0   :  { %v186_v47 = vcombine.high %v185_v44, %v185_v44  ;;  %v169_v48 = vcombine.high %v168_v45, %v168_v45  ;;  %v189_v50 = vsel %vm73_vm0, %v185_v44, 0.0  ;;  %v172_v54 = vsel %vm73_vm0, %v168_v45, 0.0 }
  0xc2   :  { %v190_v51 = vsel %vm75_vm1, %v186_v47, 0.0  ;;  %v173_v52 = vsel %vm75_vm1, %v169_v48, 0.0 }
  0xc3   :  { %140 = vadd.xlane.f32.xlu1 %v139_v49  ;;  %v191_v53 = vadd.f32 %v190_v51, %v189_v50  ;;  %v174_v55 = vadd.f32 %v173_v52, %v172_v54 }
  0xc5   :  { %192 = vadd.xlane.f32.xlu0 %v191_v53 }
  0xc7   :  { %175 = vadd.xlane.f32.xlu1 %v174_v55 }
 0x148   :  { %v159_v56 = vpop.xlane.xlu1 %158 }
 0x149   :  { %v200_v57 = vmax.f32 %v159_v56, 1.0  ;;  %vm199_vm9 = vcmp.gt.f32.partialorder %v159_v56, 0.0 }
 0x14b   :  { %261 = vrcp.f32 %v200_v57 }
 0x14c   :  { %v141_v58 = vpop.xlane.xlu1 %140 }
 0x14d   :  { %v195_v59 = vmax.f32 %v141_v58, 1.0  ;;  %vm194_vm10 = vcmp.gt.f32.partialorder %v141_v58, 0.0 }
 0x14e   :  { %v193_v61 = vpop.xlane.xlu0 %192 }
 0x14f   :  { %263 = vrcp.f32 %v195_v59 }
 0x150   :  { %v176_v1 = vpop.xlane.xlu1 %175 }
 0x158   :  { %v262_v60 = vpop.eup %261 }
 0x159   :  { %v202_v62 = vmul.f32 %v262_v60, %v193_v61 }
 0x15b   :  { %v203_v63 = vsel %vm199_vm9, %v202_v62, 0.0 }
 0x15c   :  { %v264_v0 = vpop.eup %263  ;;  %v204_v4 = vmul.f32 0.01, %v203_v63 }
 0x15d   :  { %v197_v2 = vmul.f32 %v264_v0, %v176_v1 }
 0x15f   :  { %v198_v5 = vsel %vm194_vm10, %v197_v2, 0.0 }
 0x160   :  { %v205_v6 = vadd.f32 %v204_v4, %v198_v5 }
 0x162   :  { %v213_v7 = vsel %vm212_vm11, %v205_v6, 0.0 }
 0x163   :  { %v216_v8 = vsel %vm215_vm12, %v213_v7, 0.0 }
 0x164   :  { %217 = vadd.xlane.f32.xlu0 %v216_v8 }
 0x1ed   :  { %v218_v9 = vpop.xlane.xlu0 %217 }
 0x1ee   :  { %v219_v10 = vrot.slane %v218_v9, 4 }
 0x1f0   :  { %v220_v11 = vadd.f32 %v219_v10, %v218_v9 }
 0x1f2   :  { %v221_v12 = vrot.slane %v220_v11, 2 }
 0x1f4   :  { %v222_v13 = vadd.f32 %v221_v12, %v220_v11 }
 0x1f6   :  { %v223_v14 = vrot.slane %v222_v13, 1 }
 0x1f8   :  { %v224_v15 = vadd.f32 %v223_v14, %v222_v13 }
 0x1fa   :  { %253 = vpush %v224_v15 }
 0x22b   :  { %s254_s0 = spop %253 }
 0x22c   :  { %s226_s1 = smul.f32 0.5, %s254_s0 }
 0x22e   :  { %v227_v17 = vstv %s226_s1 }
 0x22f   :  { %v228_v3 = vadd.f32 %v227_v17, %v214_v16 }
 0x231   :  { %230 = vst.msk [vmem:[#allocation7] sm:$0x1] %vm58_vm2, %v228_v3 }
 0x232   :  { %316 = shalt.err (!%p313_p0)
}
 0x233   :  { %240 = dma.vmem_to_hbm [thread:$0]  %s238_s20, 16, %s390_s2, [#allocation4]  }
 0x234   :  { %329 = dma.done.wait [#allocation4], 16  }
 0x235   :  { %330 = vsyncadd [#allocation4], 4294967280 }
 0x236   :  { %244 = vsyncpa [#allocation3], 1 }
 0x237   :  { %245 = vsyncpa [#allocation6], 1 }
 0x238   :  { %246 = vsyncpa [#allocation4], 1 }

</bundles_post_ra>
